<compile_context>
chip_gen: v5e
topology: v5e:2x2
jax: 0.10.0
libtpu: 0.0.40
codegen_flags: <defaults>
</compile_context>

<pallas_src>
import jax
import jax.numpy as jnp
from jax import lax
from jax.experimental import pallas as pl
from jax.experimental.pallas import tpu as pltpu


def _round_up(x, m):
    return ((x + m - 1) // m) * m


def _vmem_capacity_bytes():
    """Best-effort physical-VMEM query; conservative (v7x, 64 MiB) default."""
    cap = 64 * 1024 * 1024
    try:
        info = pltpu.get_tpu_info()
        cap = int(getattr(info, "vmem_capacity_bytes", cap)) or cap
    except Exception:
        pass
    return cap


def _make_partial_sums_kernel(tb, C, R, grid_r):
    """Build the kernel for one (tb, C) block per loss: writes the 6 per-loss partial
    sums into lanes 0..5 of sublane 0 of an (8, 128) f32 output tile."""
    ragged = grid_r * tb != R
    last_valid = R - (grid_r - 1) * tb  # rows of real data in the last (edge) block

    def kernel(l1_ref, l2_ref, l3_ref, l4_ref, l5_ref, l6_ref, out_ref):
        loss_refs = (l1_ref, l2_ref, l3_ref, l4_ref, l5_ref, l6_ref)

        if ragged:
            # Only the last grid step maps a partially out-of-bounds block; zero the
            # stale rows before reducing (VPU select only -- free under HBM bound).
            is_last = pl.program_id(0) == pl.num_programs(0) - 1
            valid = jnp.where(is_last, last_valid, tb)
            row_ids = lax.broadcasted_iota(jnp.int32, (tb, C), 0)
            row_mask = row_ids < valid

        sub = lax.broadcasted_iota(jnp.int32, (8, 128), 0)
        lane = lax.broadcasted_iota(jnp.int32, (8, 128), 1)
        tile = jnp.zeros((8, 128), jnp.float32)
        for i, lref in enumerate(loss_refs):
            vals = lref[...].astype(jnp.float32)   # accept bf16, accumulate in f32
            if ragged:
                vals = jnp.where(row_mask, vals, 0.0)
            partial = jnp.sum(vals)                # full reduce of this block
            tile = jnp.where((sub == 0) & (lane == i), partial, tile)
        out_ref[...] = tile

    return kernel


def multitask_loss_os(loss1, loss2, loss3, loss4, loss5, loss6, vars_param,
                      *, block_rows=None):
    """Pallas implementation of MultiTaskLossWrapper_OS.forward. Returns a scalar."""
    losses = (loss1, loss2, loss3, loss4, loss5, loss6)
    B, N = losses[0].shape
    for l in losses:
        if l.shape != (B, N):
            raise ValueError("all six loss tensors must share the same (B, N) shape")
    if tuple(vars_param.shape) != (6,):
        raise ValueError("vars_param must have shape (6,)")

    dtype = losses[0].dtype
    itemsize = jnp.dtype(dtype).itemsize

    # --- lane-dense re-layout (free contiguous reshape; sums are reshape-invariant) ---
    T = B * N
    if T % 128 == 0:
        R, C = T // 128, 128
        arrs = tuple(l.reshape(R, C) for l in losses)
    else:
        R, C = B, N
        arrs = losses  # lane-padded VMEM tiles when N is not a multiple of 128 (correct)

    # --- generation-aware VMEM limit and per-buffer byte budget ---
    vmem_cap = _vmem_capacity_bytes()
    vmem_limit = min((vmem_cap * 3) // 4, 96 * 1024 * 1024)  # 48 MiB v7x, 96 MiB v5e/v6e
    block_budget = vmem_limit // 24          # per input per pipeline buffer (12 buffers = limit/2)

    gran = {4: 8, 2: 16, 1: 32}.get(itemsize, 8)        # sublane granularity for this dtype
    bytes_per_row = _round_up(C, 128) * itemsize        # lane-PADDED VMEM row width
    budget_rows = max(1, block_budget // bytes_per_row)
    tb = max(gran, (budget_rows // gran) * gran)        # pure byte-based cap (no row cap)
    if block_rows is not None:
        tb = min(tb, max(gran, (int(block_rows) // gran) * gran))

    if tb >= R:
        if R >= 2 * gran:
            # Split into >= 2 grid steps so both v7x TensorCores get work; on 1-TC chips
            # the extra ~0.35us step is negligible.
            tb = _round_up((R + 1) // 2, gran)
        else:
            tb = R  # single block covering the full (tiny) array; full-dim block is legal
    grid_r = pl.cdiv(R, tb)

    kernel = _make_partial_sums_kernel(tb, C, R, grid_r)

    out_bytes = grid_r * 8 * 128 * 4
    cost = pl.CostEstimate(flops=6 * T, transcendentals=0,
                           bytes_accessed=6 * T * itemsize + out_bytes)

    partial_tiles = pl.pallas_call(
        kernel,
        out_shape=jax.ShapeDtypeStruct((grid_r * 8, 128), jnp.float32),
        grid=(grid_r,),
        in_specs=[pl.BlockSpec((tb, C), lambda b: (b, 0))] * 6,
        out_specs=pl.BlockSpec((8, 128), lambda b: (b, 0)),
        compiler_params=pltpu.CompilerParams(
            dimension_semantics=("parallel",),   # shard the stream across TCs (v7x)
            vmem_limit_bytes=vmem_limit,
        ),
        cost_estimate=cost,
    )(*arrs)

    # --- tiny JAX epilogue on 6 * grid_r floats ---
    totals = partial_tiles.reshape(grid_r, 8, 128)[:, 0, :6].sum(axis=0)   # (6,)
    v = vars_param.astype(jnp.float32)
    scale = 0.5 / (v * v)                      # 0.5 / vars**2
    log_v = jnp.log(v)                         # NaN for non-positive vars, same as torch
    return jnp.sum(totals * scale) / jnp.float32(B) + jnp.float32(N) * jnp.sum(log_v)


def _reference(loss1, loss2, loss3, loss4, loss5, loss6, v):
    losses = (loss1, loss2, loss3, loss4, loss5, loss6)
    total = 0.0
    for i, l in enumerate(losses):
        total = total + jnp.sum(0.5 * l.astype(jnp.float32) / v[i] ** 2 + jnp.log(v[i]), axis=-1)
    return jnp.mean(total)


if __name__ == "__main__":
    key = jax.random.PRNGKey(0)

    def run_case(B, N, dtype, block_rows=None, rtol=1e-5, atol=1e-5):
        ks = jax.random.split(jax.random.fold_in(key, B * 1000 + N), 7)
        losses = [
            jax.random.uniform(k, (B, N), dtype=jnp.float32, minval=0.0, maxval=2.0).astype(dtype)
            for k in ks[:6]
        ]
        # Parameter init of the module is six ones; perturb slightly to exercise the math.
        vars_param = jnp.ones((6,), jnp.float32) + 0.1 * jax.random.uniform(ks[6], (6,), jnp.float32)
        out = jax.block_until_ready(multitask_loss_os(*losses, vars_param, block_rows=block_rows))
        ref = _reference(*losses, vars_param)
        assert jnp.allclose(out, ref, rtol=rtol, atol=atol), (B, N, str(dtype), out, ref)

    # Small demo shape (sum over last axis, mean over batch) -- (B, N) fallback path.
    run_case(2, 8, jnp.float32)
    # Lane-dense reshape + multi-step grid + ragged last block (in-kernel row mask).
    run_case(100, 32, jnp.float32, block_rows=8)
    # bf16 inputs accumulated in f32.
    run_case(16, 48, jnp.bfloat16, rtol=1e-3, atol=1e-3)

    print("KERNEL_OK")
</pallas_src>

<mosaic_0001>
module attributes {stable_mosaic.version = 11 : i64} {
  func.func @kernel(%arg0: i32, %arg1: memref<2x8xf32, #tpu.memory_space<vmem>>, %arg2: memref<2x8xf32, #tpu.memory_space<vmem>>, %arg3: memref<2x8xf32, #tpu.memory_space<vmem>>, %arg4: memref<2x8xf32, #tpu.memory_space<vmem>>, %arg5: memref<2x8xf32, #tpu.memory_space<vmem>>, %arg6: memref<2x8xf32, #tpu.memory_space<vmem>>, %arg7: memref<8x128xf32, #tpu.memory_space<vmem>>) attributes {dimension_semantics = [#tpu.dimension_semantics<parallel>], iteration_bounds = array<i64: 1>, scalar_prefetch = 0 : i64, scratch_operands = 0 : i64, tpu.core_type = #tpu.core_type<tc>, window_params = [{transform_indices = @transform_0, window_bounds = array<i64: 2, 8>}, {transform_indices = @transform_1, window_bounds = array<i64: 2, 8>}, {transform_indices = @transform_2, window_bounds = array<i64: 2, 8>}, {transform_indices = @transform_3, window_bounds = array<i64: 2, 8>}, {transform_indices = @transform_4, window_bounds = array<i64: 2, 8>}, {transform_indices = @transform_5, window_bounds = array<i64: 2, 8>}, {transform_indices = @transform_6, window_bounds = array<i64: 8, 128>}]} {
    %0 = tpu.iota {dimensions = array<i32: 0>} : vector<8x128xi32>
    %1 = tpu.iota {dimensions = array<i32: 1>} : vector<8x128xi32>
    %cst = arith.constant 0.000000e+00 : f32
    %2 = vector.broadcast %cst : f32 to vector<8x128xf32>
    %c0 = arith.constant 0 : index
    %c0_0 = arith.constant 0 : index
    %3 = vector.load %arg1[%c0, %c0_0] : memref<2x8xf32, #tpu.memory_space<vmem>>, vector<2x8xf32>
    %4 = vector.shape_cast %3 : vector<2x8xf32> to vector<1x2x8xf32>
    %cst_1 = arith.constant dense<0.000000e+00> : vector<1xf32>
    %5 = vector.multi_reduction <add>, %4, %cst_1 [1, 2] : vector<1x2x8xf32> to vector<1xf32>
    %6 = vector.shape_cast %5 : vector<1xf32> to vector<1x1x1xf32>
    %7 = vector.extract %6[0, 0, 0] : f32 from vector<1x1x1xf32>
    %c0_i32 = arith.constant 0 : i32
    %8 = vector.broadcast %c0_i32 : i32 to vector<8x128xi32>
    %9 = arith.cmpi eq, %0, %8 : vector<8x128xi32>
    %c0_i32_2 = arith.constant 0 : i32
    %10 = vector.broadcast %c0_i32_2 : i32 to vector<8x128xi32>
    %11 = arith.cmpi eq, %1, %10 : vector<8x128xi32>
    %12 = arith.andi %9, %11 : vector<8x128xi1>
    %13 = vector.broadcast %7 : f32 to vector<8x128xf32>
    %14 = arith.select %12, %13, %2 : vector<8x128xi1>, vector<8x128xf32>
    %c0_3 = arith.constant 0 : index
    %c0_4 = arith.constant 0 : index
    %15 = vector.load %arg2[%c0_3, %c0_4] : memref<2x8xf32, #tpu.memory_space<vmem>>, vector<2x8xf32>
    %16 = vector.shape_cast %15 : vector<2x8xf32> to vector<1x2x8xf32>
    %cst_5 = arith.constant dense<0.000000e+00> : vector<1xf32>
    %17 = vector.multi_reduction <add>, %16, %cst_5 [1, 2] : vector<1x2x8xf32> to vector<1xf32>
    %18 = vector.shape_cast %17 : vector<1xf32> to vector<1x1x1xf32>
    %19 = vector.extract %18[0, 0, 0] : f32 from vector<1x1x1xf32>
    %c0_i32_6 = arith.constant 0 : i32
    %20 = vector.broadcast %c0_i32_6 : i32 to vector<8x128xi32>
    %21 = arith.cmpi eq, %0, %20 : vector<8x128xi32>
    %c1_i32 = arith.constant 1 : i32
    %22 = vector.broadcast %c1_i32 : i32 to vector<8x128xi32>
    %23 = arith.cmpi eq, %1, %22 : vector<8x128xi32>
    %24 = arith.andi %21, %23 : vector<8x128xi1>
    %25 = vector.broadcast %19 : f32 to vector<8x128xf32>
    %26 = arith.select %24, %25, %14 : vector<8x128xi1>, vector<8x128xf32>
    %c0_7 = arith.constant 0 : index
    %c0_8 = arith.constant 0 : index
    %27 = vector.load %arg3[%c0_7, %c0_8] : memref<2x8xf32, #tpu.memory_space<vmem>>, vector<2x8xf32>
    %28 = vector.shape_cast %27 : vector<2x8xf32> to vector<1x2x8xf32>
    %cst_9 = arith.constant dense<0.000000e+00> : vector<1xf32>
    %29 = vector.multi_reduction <add>, %28, %cst_9 [1, 2] : vector<1x2x8xf32> to vector<1xf32>
    %30 = vector.shape_cast %29 : vector<1xf32> to vector<1x1x1xf32>
    %31 = vector.extract %30[0, 0, 0] : f32 from vector<1x1x1xf32>
    %c0_i32_10 = arith.constant 0 : i32
    %32 = vector.broadcast %c0_i32_10 : i32 to vector<8x128xi32>
    %33 = arith.cmpi eq, %0, %32 : vector<8x128xi32>
    %c2_i32 = arith.constant 2 : i32
    %34 = vector.broadcast %c2_i32 : i32 to vector<8x128xi32>
    %35 = arith.cmpi eq, %1, %34 : vector<8x128xi32>
    %36 = arith.andi %33, %35 : vector<8x128xi1>
    %37 = vector.broadcast %31 : f32 to vector<8x128xf32>
    %38 = arith.select %36, %37, %26 : vector<8x128xi1>, vector<8x128xf32>
    %c0_11 = arith.constant 0 : index
    %c0_12 = arith.constant 0 : index
    %39 = vector.load %arg4[%c0_11, %c0_12] : memref<2x8xf32, #tpu.memory_space<vmem>>, vector<2x8xf32>
    %40 = vector.shape_cast %39 : vector<2x8xf32> to vector<1x2x8xf32>
    %cst_13 = arith.constant dense<0.000000e+00> : vector<1xf32>
    %41 = vector.multi_reduction <add>, %40, %cst_13 [1, 2] : vector<1x2x8xf32> to vector<1xf32>
    %42 = vector.shape_cast %41 : vector<1xf32> to vector<1x1x1xf32>
    %43 = vector.extract %42[0, 0, 0] : f32 from vector<1x1x1xf32>
    %c0_i32_14 = arith.constant 0 : i32
    %44 = vector.broadcast %c0_i32_14 : i32 to vector<8x128xi32>
    %45 = arith.cmpi eq, %0, %44 : vector<8x128xi32>
    %c3_i32 = arith.constant 3 : i32
    %46 = vector.broadcast %c3_i32 : i32 to vector<8x128xi32>
    %47 = arith.cmpi eq, %1, %46 : vector<8x128xi32>
    %48 = arith.andi %45, %47 : vector<8x128xi1>
    %49 = vector.broadcast %43 : f32 to vector<8x128xf32>
    %50 = arith.select %48, %49, %38 : vector<8x128xi1>, vector<8x128xf32>
    %c0_15 = arith.constant 0 : index
    %c0_16 = arith.constant 0 : index
    %51 = vector.load %arg5[%c0_15, %c0_16] : memref<2x8xf32, #tpu.memory_space<vmem>>, vector<2x8xf32>
    %52 = vector.shape_cast %51 : vector<2x8xf32> to vector<1x2x8xf32>
    %cst_17 = arith.constant dense<0.000000e+00> : vector<1xf32>
    %53 = vector.multi_reduction <add>, %52, %cst_17 [1, 2] : vector<1x2x8xf32> to vector<1xf32>
    %54 = vector.shape_cast %53 : vector<1xf32> to vector<1x1x1xf32>
    %55 = vector.extract %54[0, 0, 0] : f32 from vector<1x1x1xf32>
    %c0_i32_18 = arith.constant 0 : i32
    %56 = vector.broadcast %c0_i32_18 : i32 to vector<8x128xi32>
    %57 = arith.cmpi eq, %0, %56 : vector<8x128xi32>
    %c4_i32 = arith.constant 4 : i32
    %58 = vector.broadcast %c4_i32 : i32 to vector<8x128xi32>
    %59 = arith.cmpi eq, %1, %58 : vector<8x128xi32>
    %60 = arith.andi %57, %59 : vector<8x128xi1>
    %61 = vector.broadcast %55 : f32 to vector<8x128xf32>
    %62 = arith.select %60, %61, %50 : vector<8x128xi1>, vector<8x128xf32>
    %c0_19 = arith.constant 0 : index
    %c0_20 = arith.constant 0 : index
    %63 = vector.load %arg6[%c0_19, %c0_20] : memref<2x8xf32, #tpu.memory_space<vmem>>, vector<2x8xf32>
    %64 = vector.shape_cast %63 : vector<2x8xf32> to vector<1x2x8xf32>
    %cst_21 = arith.constant dense<0.000000e+00> : vector<1xf32>
    %65 = vector.multi_reduction <add>, %64, %cst_21 [1, 2] : vector<1x2x8xf32> to vector<1xf32>
    %66 = vector.shape_cast %65 : vector<1xf32> to vector<1x1x1xf32>
    %67 = vector.extract %66[0, 0, 0] : f32 from vector<1x1x1xf32>
    %c0_i32_22 = arith.constant 0 : i32
    %68 = vector.broadcast %c0_i32_22 : i32 to vector<8x128xi32>
    %69 = arith.cmpi eq, %0, %68 : vector<8x128xi32>
    %c5_i32 = arith.constant 5 : i32
    %70 = vector.broadcast %c5_i32 : i32 to vector<8x128xi32>
    %71 = arith.cmpi eq, %1, %70 : vector<8x128xi32>
    %72 = arith.andi %69, %71 : vector<8x128xi1>
    %73 = vector.broadcast %67 : f32 to vector<8x128xf32>
    %74 = arith.select %72, %73, %62 : vector<8x128xi1>, vector<8x128xf32>
    %c0_23 = arith.constant 0 : index
    %c0_24 = arith.constant 0 : index
    %75 = vector.load %arg7[%c0_23, %c0_24] : memref<8x128xf32, #tpu.memory_space<vmem>>, vector<8x128xf32>
    tpu.vector_store %arg7[%c0_23, %c0_24], %74 {strides = array<i32>} : memref<8x128xf32, #tpu.memory_space<vmem>>, vector<8x128xf32>,
    return
  }
  func.func @transform_0(%arg0: i32) -> (i32, i32) {
    %c0_i32 = arith.constant 0 : i32
    %c0_i32_0 = arith.constant 0 : i32
    return %arg0, %c0_i32 : i32, i32
  }
  func.func @transform_1(%arg0: i32) -> (i32, i32) {
    %c0_i32 = arith.constant 0 : i32
    %c0_i32_0 = arith.constant 0 : i32
    return %arg0, %c0_i32 : i32, i32
  }
  func.func @transform_2(%arg0: i32) -> (i32, i32) {
    %c0_i32 = arith.constant 0 : i32
    %c0_i32_0 = arith.constant 0 : i32
    return %arg0, %c0_i32 : i32, i32
  }
  func.func @transform_3(%arg0: i32) -> (i32, i32) {
    %c0_i32 = arith.constant 0 : i32
    %c0_i32_0 = arith.constant 0 : i32
    return %arg0, %c0_i32 : i32, i32
  }
  func.func @transform_4(%arg0: i32) -> (i32, i32) {
    %c0_i32 = arith.constant 0 : i32
    %c0_i32_0 = arith.constant 0 : i32
    return %arg0, %c0_i32 : i32, i32
  }
  func.func @transform_5(%arg0: i32) -> (i32, i32) {
    %c0_i32 = arith.constant 0 : i32
    %c0_i32_0 = arith.constant 0 : i32
    return %arg0, %c0_i32 : i32, i32
  }
  func.func @transform_6(%arg0: i32) -> (i32, i32) {
    %c0_i32 = arith.constant 0 : i32
    %c0_i32_0 = arith.constant 0 : i32
    return %arg0, %c0_i32 : i32, i32
  }
}

</mosaic_0001>

<bundles_post_ra>
// kernel: tpu_custom_call.1
= control target key start
LH: loop header
LB: loop body
LE: loop exit
PB: predicated region body
PF: predicated region fallthrough
CT: control target
= control target key end

     0   :  { %11 = vsyncpa [#allocation3], 0  ;;  %s408_s0 = inlined_call_operand.hbm [shape: f32[2,8], index: 0, kind: input, shape index: {}]   ;;  %s409_s1 = inlined_call_operand.hbm [shape: f32[2,8], index: 1, kind: input, shape index: {}]   ;;  %s410_s2 = inlined_call_operand.hbm [shape: f32[2,8], index: 2, kind: input, shape index: {}]   ;;  %s411_s3 = inlined_call_operand.vmem [shape: f32[2,8], index: 3, kind: input, shape index: {}]   ;;  %s412_s4 = inlined_call_operand.hbm [shape: f32[2,8], index: 4, kind: input, shape index: {}]   ;;  %s413_s5 = inlined_call_operand.vmem [shape: f32[2,8], index: 5, kind: input, shape index: {}]   ;;  %s414_s6 = inlined_call_operand.hbm [shape: f32[8,128], index: 6, kind: output, shape index: {}]  }
   0x1   :  { %12 = vsyncpa [#allocation6], 0 }
   0x2   :  { %13 = vsyncpa [#allocation9], 0  ;;  %s31_s23 = sshll.u32 %s409_s1, 4  ;;  %s32_s23 = int_to_ptr.hbm [resolvable:$true] %s31_s23 }
   0x3   :  { %14 = vsyncpa [#allocation4], 0  ;;  %s340_s24 = smov [#allocation5]   ;;  %s20_s28 = sshll.u32 %s408_s0, 4  ;;  %s21_s28 = int_to_ptr.hbm [resolvable:$true] %s20_s28 }
   0x4   :  { %s33_s25 = sshll.u32 %s340_s24, 4  ;;  %s341_s29 = smov [#allocation2]   ;;  %s34_s25 = int_to_ptr.vmem [resolvable:$true] %s33_s25 }
   0x5   :  { %36 = dma.hbm_to_vmem [thread:$0]  %s32_s23, 32, %s34_s25, [#allocation6]  }
   0x6   :  { %s22_s30 = sshll.u32 %s341_s29, 4  ;;  %s42_s9 = sshll.u32 %s410_s2, 4  ;;  %s23_s30 = int_to_ptr.vmem [resolvable:$true] %s22_s30  ;;  %s43_s9 = int_to_ptr.hbm [resolvable:$true] %s42_s9 }
   0x7   :  { %25 = dma.hbm_to_vmem [thread:$0]  %s21_s28, 32, %s23_s30, [#allocation3]  }
   0x8   :  { %s55_s11 = sshll.u32 %s412_s4, 4  ;;  %s342_s12 = smov [#allocation7]   ;;  %s56_s11 = int_to_ptr.hbm [resolvable:$true] %s55_s11 }
   0x9   :  { %s44_s13 = sshll.u32 %s342_s12, 4  ;;  %s343_s0 = smov [#allocation8]   ;;  %s45_s13 = int_to_ptr.vmem [resolvable:$true] %s44_s13 }
   0xa   :  { %47 = dma.hbm_to_vmem [thread:$0]  %s43_s9, 32, %s45_s13, [#allocation6]  }
   0xb   :  { %s57_s14 = sshll.u32 %s343_s0, 4  ;;  %s58_s14 = int_to_ptr.vmem [resolvable:$true] %s57_s14 }
   0xc   :  { %60 = dma.hbm_to_vmem [thread:$0]  %s56_s11, 32, %s58_s14, [#allocation9]  }
   0xd   :  { %332 = dma.done.wait [#allocation3], 32  }
   0xe   :  { %333 = vsyncadd [#allocation3], 4294967264 }
   0xf   :  { %334 = dma.done.wait [#allocation6], 64  }
  0x10   :  { %335 = vsyncadd [#allocation6], 4294967232 }
  0x11   :  { %336 = dma.done.wait [#allocation9], 32  }
  0x12   :  { %337 = vsyncadd [#allocation9], 4294967264  ;;  %vm84_vm0 = vcmask 58368   ;;  %v145_v0 = vld [vmem:[#allocation8] sm:$0x3]  ;;  %v79_v54 = vlaneseq  ;;  %s183_s20 = sshll.u32 %s414_s6, 4  ;;  %s184_s20 = int_to_ptr.hbm [resolvable:$true] %s183_s20 }
  0x13   :  { %v115_v1 = vld [vmem:[#allocation7] sm:$0x3]  ;;  %v83_v2 = vld [vmem:[#allocation2] sm:$0x3]  ;;  %v146_v3 = vsel %vm84_vm0, %v145_v0, 0.0  ;;  %s344_s22 = smov [#allocation10]  }
  0x14   :  { %v116_v4 = vsel %vm84_vm0, %v115_v1, 0.0  ;;  %v85_v5 = vsel %vm84_vm0, %v83_v2, 0.0  ;;  %147 = vadd.xlane.f32.xlu2 %v146_v3  ;;  %v160_v6 = vld [vmem:[%s413_s5] sm:$0x3]  ;;  %v100_v8 = vld [vmem:[#allocation5] sm:$0x3] }
  0x15   :  { %117 = vadd.xlane.f32.xlu1 %v116_v4  ;;  %86 = vadd.xlane.f32.xlu0 %v85_v5  ;;  %v130_v7 = vld [vmem:[%s411_s3] sm:$0x3]  ;;  %v161_v9 = vsel %vm84_vm0, %v160_v6, 0.0  ;;  %v101_v11 = vsel %vm84_vm0, %v100_v8, 0.0  ;;  %v80_v55 = vshrl.u32 %v79_v54, 7  ;;  %v82_v56 = vand.u32 127, %v79_v54 }
  0x16   :  { %v131_v10 = vsel %vm84_vm0, %v130_v7, 0.0  ;;  %s181_s23 = sshll.u32 %s344_s22, 4  ;;  %s182_s23 = int_to_ptr.vmem [resolvable:$true] %s181_s23 }
  0x17   :  { %vm95_vm1 = vcmp.eq.s32.totalorder %v80_v55, 0  ;;  %vm96_vm2 = vcmp.eq.s32.totalorder %v82_v56, 0  ;;  %vm111_vm3 = vcmp.eq.s32.totalorder %v82_v56, 1  ;;  %vm126_vm4 = vcmp.eq.s32.totalorder %v82_v56, 2 }
  0x18   :  { %vm97_vm5 = vmand %vm95_vm1, %vm96_vm2  ;;  %vm141_vm6 = vcmp.eq.s32.totalorder %v82_v56, 3  ;;  %vm156_vm8 = vcmp.eq.s32.totalorder %v82_v56, 4  ;;  %vm171_vm10 = vcmp.eq.s32.totalorder %v82_v56, 5 }
  0x19   :  { %vm112_vm7 = vmand %vm95_vm1, %vm111_vm3 }
  0x1a   :  { %vm127_vm9 = vmand %vm95_vm1, %vm126_vm4 }
  0x1b   :  { %vm142_vm11 = vmand %vm95_vm1, %vm141_vm6 }
  0x1c   :  { %162 = vadd.xlane.f32.xlu2 %v161_v9  ;;  %vm157_vm12 = vmand %vm95_vm1, %vm156_vm8 }
  0x1d   :  { %132 = vadd.xlane.f32.xlu1 %v131_v10  ;;  %102 = vadd.xlane.f32.xlu0 %v101_v11  ;;  %vm172_vm13 = vmand %vm95_vm1, %vm171_vm10 }
  0x87   :  { %v148_v12 = vpop.xlane.xlu2 %147 }
  0x88   :  { %v118_v13 = vpop.xlane.xlu1 %117  ;;  %v87_v15 = vpop.xlane.xlu0 %86  ;;  %v149_v17 = vrot.slane %v148_v12, 4 }
  0x89   :  { %v119_v14 = vrot.slane %v118_v13, 4  ;;  %v88_v16 = vrot.slane %v87_v15, 4 }
  0x8a   :  { %v150_v21 = vadd.f32 %v149_v17, %v148_v12 }
  0x8b   :  { %v89_v18 = vadd.f32 %v88_v16, %v87_v15  ;;  %v120_v19 = vadd.f32 %v119_v14, %v118_v13 }
  0x8c   :  { %v151_v31 = vrot.slane %v150_v21, 2 }
  0x8d   :  { %v90_v20 = vrot.slane %v89_v18, 2  ;;  %v121_v25 = vrot.slane %v120_v19, 2 }
  0x8e   :  { %v152_v42 = vadd.f32 %v151_v31, %v150_v21 }
  0x8f   :  { %v163_v22 = vpop.xlane.xlu2 %162  ;;  %v91_v24 = vadd.f32 %v90_v20, %v89_v18  ;;  %v122_v38 = vadd.f32 %v121_v25, %v120_v19 }
  0x90   :  { %v133_v23 = vpop.xlane.xlu1 %132  ;;  %v164_v26 = vrot.slane %v163_v22, 4  ;;  %v103_v28 = vpop.xlane.xlu0 %102  ;;  %v153_v48 = vrot.slane %v152_v42, 1 }
  0x91   :  { %v134_v27 = vrot.slane %v133_v23, 4  ;;  %v104_v29 = vrot.slane %v103_v28, 4  ;;  %v92_v30 = vrot.slane %v91_v24, 1  ;;  %v123_v44 = vrot.slane %v122_v38, 1 }
  0x92   :  { %v165_v32 = vadd.f32 %v164_v26, %v163_v22  ;;  %v154_v53 = vadd.f32 %v153_v48, %v152_v42 }
  0x93   :  { %v135_v33 = vadd.f32 %v134_v27, %v133_v23  ;;  %v105_v34 = vadd.f32 %v104_v29, %v103_v28  ;;  %v93_v35 = vadd.f32 %v92_v30, %v91_v24  ;;  %v124_v51 = vadd.f32 %v123_v44, %v122_v38 }
  0x94   :  { %v166_v36 = vrot.slane %v165_v32, 2 }
  0x95   :  { %v136_v37 = vrot.slane %v135_v33, 2  ;;  %v106_v39 = vrot.slane %v105_v34, 2  ;;  %195 = vpush %v93_v35 }
  0x96   :  { %v167_v40 = vadd.f32 %v166_v36, %v165_v32 }
  0x97   :  { %v137_v41 = vadd.f32 %v136_v37, %v135_v33  ;;  %v107_v43 = vadd.f32 %v106_v39, %v105_v34 }
  0x98   :  { %v168_v47 = vrot.slane %v167_v40, 1 }
  0x99   :  { %v138_v45 = vrot.slane %v137_v41, 1  ;;  %v108_v46 = vrot.slane %v107_v43, 1 }
  0x9a   :  { %v169_v52 = vadd.f32 %v168_v47, %v167_v40 }
  0x9b   :  { %v109_v49 = vadd.f32 %v108_v46, %v107_v43  ;;  %v139_v50 = vadd.f32 %v138_v45, %v137_v41 }
  0x9d   :  { %197 = vpush %v109_v49 }
  0x9e   :  { %199 = vpush %v124_v51 }
  0x9f   :  { %201 = vpush %v139_v50 }
  0xa0   :  { %203 = vpush %v154_v53 }
  0xa1   :  { %205 = vpush %v169_v52 }
  0xc6   :  { %s196_s3 = spop %195 }
  0xc7   :  { %v98_v57 = vstv %s196_s3 }
  0xc8   :  { %v99_v58 = vsel %vm97_vm5, %v98_v57, 0.0 }
  0xce   :  { %s198_s5 = spop %197 }
  0xcf   :  { %v113_v59 = vstv %s198_s5  ;;  %s200_s17 = spop %199 }
  0xd0   :  { %v114_v60 = vsel %vm112_vm7, %v113_v59, %v99_v58  ;;  %v128_v61 = vstv %s200_s17  ;;  %s202_s21 = spop %201 }
  0xd1   :  { %v129_v62 = vsel %vm127_vm9, %v128_v61, %v114_v60  ;;  %v143_v63 = vstv %s202_s21  ;;  %s204_s24 = spop %203 }
  0xd2   :  { %v144_v0 = vsel %vm142_vm11, %v143_v63, %v129_v62  ;;  %v158_v1 = vstv %s204_s24  ;;  %s206_s25 = spop %205 }
  0xd3   :  { %v159_v2 = vsel %vm157_vm12, %v158_v1, %v144_v0  ;;  %v173_v3 = vstv %s206_s25 }
  0xd4   :  { %v174_v4 = vsel %vm172_vm13, %v173_v3, %v159_v2 }
  0xd5   :  { %175 = vst [vmem:[#allocation10] sm:$0xff] %v174_v4 }
  0xd6   :  { %186 = dma.vmem_to_hbm [thread:$0]  %s182_s23, 128, %s184_s20, [#allocation4]  }
  0xd7   :  { %338 = dma.done.wait [#allocation4], 128  }
  0xd8   :  { %339 = vsyncadd [#allocation4], 4294967168 }
  0xd9   :  { %191 = vsyncpa [#allocation3], 1 }
  0xda   :  { %192 = vsyncpa [#allocation6], 1 }
  0xdb   :  { %193 = vsyncpa [#allocation9], 1 }
  0xdc   :  { %194 = vsyncpa [#allocation4], 1 }

</bundles_post_ra>
